<compile_context>
chip_gen: v7x
topology: tpu7x:2x2x1
jax: 0.10.0
libtpu: 0.0.40
codegen_flags: <defaults>
</compile_context>

<pallas_src>
import jax
import jax.numpy as jnp
from jax.experimental import pallas as pl
from jax.experimental.pallas import tpu as pltpu

N = 41              # signal length fixed by the module's (41, 41) h_matrix
K_SIZE = 11
HALF = K_SIZE // 2  # 5
LANES = 128         # lane width of the in-kernel padded working tile

# Wrap-safety invariant: the circular pltpu.roll wrap (max |shift| = HALF) must
# land in -inf padded lanes on both effective sides. If N or HALF ever change
# such that this fails, boundary results would silently corrupt.
assert LANES - N >= HALF, "need >= HALF lanes of -inf padding to absorb roll wrap"


def _cdiv(a, b):
    return -(-a // b)


def _round_up(a, b):
    return _cdiv(a, b) * b


def dilation1d_kernel(c_ref, x_ref, o_ref, pad_ref):
    # c_ref:   SMEM (1,)          -- c = -0.25/scale, precomputed in the wrapper
    # x_ref:   VMEM (tb, N)       -- packed input tile (no HBM lane padding)
    # o_ref:   VMEM (tb, N)       -- packed output tile
    # pad_ref: VMEM (tb, LANES)   -- scratch: lane-padded working tile
    c = c_ref[0]

    # Build the 128-lane working tile: signal in lanes [0, N), -inf elsewhere.
    # Unconditional -inf store => no dependence on program_id(0)==0 having run
    # on this core (safe under megacore sharding of the "parallel" axis); the
    # extra VMEM stores are hidden under the XLU-roll / DMA bottleneck.
    pad_ref[:, :N] = x_ref[...]
    pad_ref[:, N:] = jnp.full((pad_ref.shape[0], LANES - N), -jnp.inf,
                              dtype=pad_ref.dtype)
    x = pad_ref[...]

    acc = x                                    # k = 0 tap (h_0 = 0)
    for d in range(1, HALF + 1):
        h_d = (d * d) * c                      # scalar, computed once per tap
        # roll(+d) reads x[i-d], roll(LANES-d) reads x[i+d]; h is symmetric in
        # the offset so the sign convention is irrelevant, and the circular
        # wrap lands in -inf lanes (LANES - N >= HALF, asserted above).
        m = jnp.maximum(pltpu.roll(x, d, axis=1),
                        pltpu.roll(x, LANES - d, axis=1))
        acc = jnp.maximum(acc, m + h_d)        # 3 VPU ops per tap

    o_ref[...] = acc[:, :N]                    # write back only the real lanes


def _dilation1d_pallas(x2d, scale, *, tb=None, tb_cap=4096):
    B, n = x2d.shape
    assert n == N

    if tb is None:
        g = _cdiv(B, tb_cap)
        if B >= 1024:                 # keep >=2 "parallel" steps for v7x's 2 TCs
            g = max(g, 2)
        tb = _cdiv(B, g)
    # Waste-free rounding: never blow b_pad far past B (old scheme could ~2x it).
    tb = _round_up(min(max(int(tb), 1), _round_up(B, 8)), 8)
    b_pad = _round_up(B, tb)

    # Only the batch axis is padded (with zeros; those rows are discarded).
    x_pad = x2d if b_pad == B else jnp.pad(x2d, ((0, b_pad - B), (0, 0)))

    # Hoisted scalar: h_k = k*k * c, c = -1/(4*scale).
    c_arr = (jnp.float32(-0.25) / jnp.asarray(scale, jnp.float32)).reshape(1)

    out = pl.pallas_call(
        dilation1d_kernel,
        out_shape=jax.ShapeDtypeStruct((b_pad, N), jnp.float32),
        grid=(b_pad // tb,),
        in_specs=[
            pl.BlockSpec(memory_space=pltpu.MemorySpace.SMEM),   # c (whole array)
            pl.BlockSpec((tb, N), lambda b: (b, 0)),             # packed x tile
        ],
        out_specs=pl.BlockSpec((tb, N), lambda b: (b, 0)),       # packed out tile
        scratch_shapes=[pltpu.VMEM((tb, LANES), jnp.float32)],
        compiler_params=pltpu.CompilerParams(
            dimension_semantics=("parallel",)),
    )(c_arr, x_pad)

    return out[:B]


def _dilation1d_jnp(x2d, scale):
    """Plain-XLA 11-tap path for tiny batches (pallas_call launch dominates)."""
    c = jnp.float32(-0.25) / jnp.asarray(scale, jnp.float32)
    xp = jnp.pad(x2d, ((0, 0), (HALF, HALF)), constant_values=-jnp.inf)
    taps = [xp[:, HALF + d: HALF + d + N] + (d * d) * c
            for d in range(-HALF, HALF + 1)]
    return jnp.max(jnp.stack(taps, axis=0), axis=0)


def dilation1d(x, scale, *, tb=None, tb_cap=4096, use_pallas=None):
    """x: (N,) or (B, N) float32 signal(s); scale: scalar. Same leading shape out."""
    x = jnp.asarray(x, jnp.float32)
    squeeze = x.ndim == 1
    x2d = x[None, :] if squeeze else x
    B, n = x2d.shape
    assert n == N, f"signal length must be {N} (fixed by the module's h_matrix)"

    if use_pallas is None:
        use_pallas = B >= 64

    if use_pallas:
        out = _dilation1d_pallas(x2d, scale, tb=tb, tb_cap=tb_cap)
    else:
        out = _dilation1d_jnp(x2d, scale)
    return out[0] if squeeze else out


def dilation1d_ref(x, scale):
    """Pure-JAX reference mirroring the PyTorch forward (banded h_matrix)."""
    x = jnp.asarray(x, jnp.float32)
    i = jnp.arange(N)[:, None]
    j = jnp.arange(N)[None, :]
    d = j - i
    h_matrix = jnp.where(
        jnp.abs(d) <= HALF,
        -(d.astype(jnp.float32) ** 2) / (4.0 * jnp.float32(scale)),
        -jnp.inf,
    )
    if x.ndim == 1:
        return jnp.max(x[None, :] + h_matrix, axis=1)
    return jnp.max(x[:, None, :] + h_matrix[None, :, :], axis=2)


if __name__ == "__main__":
    key = jax.random.PRNGKey(0)
    k1, k2, k3 = jax.random.split(key, 3)
    scale = jnp.float32(0.5)   # module __init__ scalar parameter

    # Module's literal contract: one (41,) signal. Force the Pallas path here
    # to exercise the kernel (default dispatch would use the jnp fallback).
    x1 = jax.random.normal(k1, (N,), dtype=jnp.float32)
    out1 = jax.block_until_ready(dilation1d(x1, scale, use_pallas=True))
    ref1 = dilation1d_ref(x1, scale)
    assert out1.shape == (N,) and out1.dtype == jnp.float32
    assert jnp.allclose(out1, ref1, rtol=1e-5, atol=1e-5)

    # Small batch with an explicit small tile -> multi-step grid path.
    xb = jax.random.normal(k2, (24, N), dtype=jnp.float32)
    outb = jax.block_until_ready(dilation1d(xb, scale, use_pallas=True, tb=8))
    refb = dilation1d_ref(xb, scale)
    assert outb.shape == (24, N)
    assert jnp.allclose(outb, refb, rtol=1e-5, atol=1e-5)

    # Default dispatch for a tiny batch (jnp fallback) must match as well.
    xs = jax.random.normal(k3, (2, N), dtype=jnp.float32)
    outs = jax.block_until_ready(dilation1d(xs, scale))
    assert jnp.allclose(outs, dilation1d_ref(xs, scale), rtol=1e-5, atol=1e-5)

    print("KERNEL_OK")
</pallas_src>

<mosaic_0001>
module attributes {stable_mosaic.version = 11 : i64} {
  func.func @dilation1d_kernel(%arg0: i32, %arg1: memref<1xf32, #tpu.memory_space<smem>>, %arg2: memref<8x41xf32, #tpu.memory_space<vmem>>, %arg3: memref<8x41xf32, #tpu.memory_space<vmem>>, %arg4: memref<8x128xf32, #tpu.memory_space<vmem>>) attributes {dimension_semantics = [#tpu.dimension_semantics<parallel>], iteration_bounds = array<i64: 1>, scalar_prefetch = 0 : i64, scratch_operands = 1 : i64, tpu.core_type = #tpu.core_type<tc>, window_params = [{transform_indices = @transform_0, window_bounds = array<i64: 1>}, {transform_indices = @transform_1, window_bounds = array<i64: 8, 41>}, {transform_indices = @transform_2, window_bounds = array<i64: 8, 41>}]} {
    %c0 = arith.constant 0 : index
    %0 = memref.load %arg1[%c0] : memref<1xf32, #tpu.memory_space<smem>>
    %c0_0 = arith.constant 0 : index
    %c0_1 = arith.constant 0 : index
    %1 = vector.load %arg2[%c0_0, %c0_1] : memref<8x41xf32, #tpu.memory_space<vmem>>, vector<8x41xf32>
    %c0_2 = arith.constant 0 : index
    %c0_3 = arith.constant 0 : index
    %2 = vector.load %arg4[%c0_2, %c0_3] : memref<8x128xf32, #tpu.memory_space<vmem>>, vector<8x41xf32>
    tpu.vector_store %arg4[%c0_2, %c0_3], %1 {strides = array<i32>} : memref<8x128xf32, #tpu.memory_space<vmem>>, vector<8x41xf32>,
    %cst = arith.constant 0xFF800000 : f32
    %3 = vector.broadcast %cst : f32 to vector<8x87xf32>
    %c0_4 = arith.constant 0 : index
    %c41 = arith.constant 41 : index
    %4 = vector.load %arg4[%c0_4, %c41] : memref<8x128xf32, #tpu.memory_space<vmem>>, vector<8x87xf32>
    tpu.vector_store %arg4[%c0_4, %c41], %3 {strides = array<i32>} : memref<8x128xf32, #tpu.memory_space<vmem>>, vector<8x87xf32>,
    %c0_5 = arith.constant 0 : index
    %c0_6 = arith.constant 0 : index
    %5 = vector.load %arg4[%c0_5, %c0_6] : memref<8x128xf32, #tpu.memory_space<vmem>>, vector<8x128xf32>
    %cst_7 = arith.constant 1.000000e+00 : f32
    %6 = arith.mulf %cst_7, %0 : f32
    %c1_i32 = arith.constant 1 : i32
    %7 = tpu.dynamic_rotate %5 by %c1_i32 dim 1 : vector<8x128xf32>, i32 -> vector<8x128xf32>
    %c127_i32 = arith.constant 127 : i32
    %8 = tpu.dynamic_rotate %5 by %c127_i32 dim 1 : vector<8x128xf32>, i32 -> vector<8x128xf32>
    %9 = arith.maximumf %7, %8 : vector<8x128xf32>
    %10 = vector.broadcast %6 : f32 to vector<8x128xf32>
    %11 = arith.addf %9, %10 : vector<8x128xf32>
    %12 = arith.maximumf %5, %11 : vector<8x128xf32>
    %cst_8 = arith.constant 4.000000e+00 : f32
    %13 = arith.mulf %cst_8, %0 : f32
    %c2_i32 = arith.constant 2 : i32
    %14 = tpu.dynamic_rotate %5 by %c2_i32 dim 1 : vector<8x128xf32>, i32 -> vector<8x128xf32>
    %c126_i32 = arith.constant 126 : i32
    %15 = tpu.dynamic_rotate %5 by %c126_i32 dim 1 : vector<8x128xf32>, i32 -> vector<8x128xf32>
    %16 = arith.maximumf %14, %15 : vector<8x128xf32>
    %17 = vector.broadcast %13 : f32 to vector<8x128xf32>
    %18 = arith.addf %16, %17 : vector<8x128xf32>
    %19 = arith.maximumf %12, %18 : vector<8x128xf32>
    %cst_9 = arith.constant 9.000000e+00 : f32
    %20 = arith.mulf %cst_9, %0 : f32
    %c3_i32 = arith.constant 3 : i32
    %21 = tpu.dynamic_rotate %5 by %c3_i32 dim 1 : vector<8x128xf32>, i32 -> vector<8x128xf32>
    %c125_i32 = arith.constant 125 : i32
    %22 = tpu.dynamic_rotate %5 by %c125_i32 dim 1 : vector<8x128xf32>, i32 -> vector<8x128xf32>
    %23 = arith.maximumf %21, %22 : vector<8x128xf32>
    %24 = vector.broadcast %20 : f32 to vector<8x128xf32>
    %25 = arith.addf %23, %24 : vector<8x128xf32>
    %26 = arith.maximumf %19, %25 : vector<8x128xf32>
    %cst_10 = arith.constant 1.600000e+01 : f32
    %27 = arith.mulf %cst_10, %0 : f32
    %c4_i32 = arith.constant 4 : i32
    %28 = tpu.dynamic_rotate %5 by %c4_i32 dim 1 : vector<8x128xf32>, i32 -> vector<8x128xf32>
    %c124_i32 = arith.constant 124 : i32
    %29 = tpu.dynamic_rotate %5 by %c124_i32 dim 1 : vector<8x128xf32>, i32 -> vector<8x128xf32>
    %30 = arith.maximumf %28, %29 : vector<8x128xf32>
    %31 = vector.broadcast %27 : f32 to vector<8x128xf32>
    %32 = arith.addf %30, %31 : vector<8x128xf32>
    %33 = arith.maximumf %26, %32 : vector<8x128xf32>
    %cst_11 = arith.constant 2.500000e+01 : f32
    %34 = arith.mulf %cst_11, %0 : f32
    %c5_i32 = arith.constant 5 : i32
    %35 = tpu.dynamic_rotate %5 by %c5_i32 dim 1 : vector<8x128xf32>, i32 -> vector<8x128xf32>
    %c123_i32 = arith.constant 123 : i32
    %36 = tpu.dynamic_rotate %5 by %c123_i32 dim 1 : vector<8x128xf32>, i32 -> vector<8x128xf32>
    %37 = arith.maximumf %35, %36 : vector<8x128xf32>
    %38 = vector.broadcast %34 : f32 to vector<8x128xf32>
    %39 = arith.addf %37, %38 : vector<8x128xf32>
    %40 = arith.maximumf %33, %39 : vector<8x128xf32>
    %41 = vector.extract_strided_slice %40 {offsets = [0, 0], sizes = [8, 41], strides = [1, 1]} : vector<8x128xf32> to vector<8x41xf32>
    %c0_12 = arith.constant 0 : index
    %c0_13 = arith.constant 0 : index
    %42 = vector.load %arg3[%c0_12, %c0_13] : memref<8x41xf32, #tpu.memory_space<vmem>>, vector<8x41xf32>
    tpu.vector_store %arg3[%c0_12, %c0_13], %41 {strides = array<i32>} : memref<8x41xf32, #tpu.memory_space<vmem>>, vector<8x41xf32>,
    return
  }
  func.func @transform_0(%arg0: i32) -> i32 {
    %c0_i32 = arith.constant 0 : i32
    %c0_i32_0 = arith.constant 0 : i32
    return %c0_i32 : i32
  }
  func.func @transform_1(%arg0: i32) -> (i32, i32) {
    %c0_i32 = arith.constant 0 : i32
    %c0_i32_0 = arith.constant 0 : i32
    return %arg0, %c0_i32 : i32, i32
  }
  func.func @transform_2(%arg0: i32) -> (i32, i32) {
    %c0_i32 = arith.constant 0 : i32
    %c0_i32_0 = arith.constant 0 : i32
    return %arg0, %c0_i32 : i32, i32
  }
}

</mosaic_0001>

<bundles_post_ra>
// kernel: tpu_custom_call.1
= control target key start
LH: loop header
LB: loop body
LE: loop exit
PB: predicated region body
PF: predicated region fallthrough
CT: control target
= control target key end

     0   :  { %8 = vsyncpa [#allocation5], 0  ;;  %s222_s0 = inlined_call_operand.<no memory space> [shape: f32[1], index: 0, kind: input, shape index: {}]   ;;  %s223_s1 = inlined_call_operand.hbm [shape: f32[8,41], index: 1, kind: input, shape index: {}]   ;;  %s224_s2 = inlined_call_operand.hbm [shape: f32[8,41], index: 2, kind: output, shape index: {}]  }
   0x1   :  { %9 = vsyncpa [#allocation6], 0  ;;  %s153_s9 = smov [#allocation4]   ;;  %s105_s13 = scalar_lea.hbm %s223_s1, 128 }
   0x2   :  { %s18_s10 = sshll.u32 %s153_s9, 4  ;;  %p106_p0 = scmp.ne.s32.totalorder %s223_s1, %s105_s13  ;;  %s19_s10 = int_to_ptr.vmem [resolvable:$true] %s18_s10 }
   0x3   :  { %p109_p1 = scmp.lt.u32.totalorder %s105_s13, %s223_s1 }
   0x5   :  { %p111_p2 = pnand %p109_p1, %p106_p0 }
   0x7   :  { %114 = shalt.err (!%p111_p2)
}
   0x8   :  { %s115_s18 = scalar_lea.vmem %s19_s10, 128  ;;  %p120_p4 = scmp.lt.s32.totalorder %s19_s10, %s19_s10 }
   0x9   :  { %p116_p3 = scmp.ne.s32.totalorder %s19_s10, %s115_s18  ;;  %p121_p5 = scmp.lt.s32.totalorder %s115_s18, %s115_s18 }
   0xb   :  { %p122_p6 = por %p121_p5, %p120_p4 }
   0xd   :  { %p123_p7 = pnand %p122_p6, %p116_p3 }
   0xf   :  { %126 = shalt.err (!%p123_p7)
}
  0x10   :  { %21 = dma.hbm_to_vmem [thread:$0]  %s223_s1, 128, %s19_s10, [#allocation5]  }
  0x11   :  { %149 = dma.done.wait [#allocation5], 128  }
  0x12   :  { %150 = vsyncadd [#allocation5], 4294967168  ;;  %vm27_vm0 = vcmask 334848   ;;  %vm29_vm1 = vcmask 1047880   ;;  %v26_v0 = vld [vmem:[#allocation4] sm:$0xff]  ;;  %v154_v1 = vmov -inf   ;;  %v37_v6 = vstv %s222_s0 }
  0x13   :  { %28 = vst.msk [vmem:[#allocation2] sm:$0xff] %vm27_vm0, %v26_v0  ;;  %s155_s21 = smov 2   ;;  %s156_s22 = smov 1  }
  0x14   :  { %30 = vst.msk [vmem:[#allocation2] sm:$0xff] %vm29_vm1, %v154_v1  ;;  %s157_s23 = smov 126   ;;  %s158_s24 = smov 127  }
  0x15   :  { %s159_s25 = smov 125   ;;  %s160_s1 = smov 3  }
  0x16   :  { %s161_s26 = smov 124   ;;  %s162_s27 = smov 4  }
  0x17   :  { %s163_s28 = smov 123   ;;  %s164_s29 = smov 5  }
  0x18   :  { %s40_s4 = smul.f32 4.0, %s222_s0  ;;  %s165_s16 = smov [#allocation7]  }
  0x19   :  { %s49_s9 = smul.f32 9.0, %s222_s0  ;;  %s83_s17 = sshll.u32 %s165_s16, 4  ;;  %s84_s17 = int_to_ptr.vmem [resolvable:$true] %s83_s17 }
  0x1a   :  { %v46_v11 = vstv %s40_s4  ;;  %s58_s12 = smul.f32 16.0, %s222_s0  ;;  %s127_s18 = scalar_lea.vmem %s84_s17, 128 }
  0x1b   :  { %v31_v2 = vld [vmem:[#allocation2] sm:$0xff]  ;;  %v55_v16 = vstv %s49_s9  ;;  %s67_s15 = smul.f32 25.0, %s222_s0  ;;  %p128_p8 = scmp.ne.s32.totalorder %s84_s17, %s127_s18 }
  0x1c   :  { %41 = vrot.lane.b32.xlu1 %v31_v2, %s155_s21  ;;  %32 = vrot.lane.b32.xlu0 %v31_v2, %s156_s22  ;;  %v64_v19 = vstv %s58_s12  ;;  %p132_p9 = scmp.lt.s32.totalorder %s84_s17, %s84_s17  ;;  %p133_p10 = scmp.lt.s32.totalorder %s127_s18, %s127_s18 }
  0x1d   :  { %v73_v26 = vstv %s67_s15 }
  0x1e   :  { %p134_p11 = por %p133_p10, %p132_p9 }
  0x20   :  { %43 = vrot.lane.b32.xlu1 %v31_v2, %s157_s23  ;;  %34 = vrot.lane.b32.xlu0 %v31_v2, %s158_s24  ;;  %p135_p12 = pnand %p134_p11, %p128_p8 }
  0x24   :  { %52 = vrot.lane.b32.xlu1 %v31_v2, %s159_s25  ;;  %50 = vrot.lane.b32.xlu0 %v31_v2, %s160_s1 }
  0x28   :  { %61 = vrot.lane.b32.xlu1 %v31_v2, %s161_s26  ;;  %59 = vrot.lane.b32.xlu0 %v31_v2, %s162_s27 }
  0x2c   :  { %70 = vrot.lane.b32.xlu1 %v31_v2, %s163_s28  ;;  %68 = vrot.lane.b32.xlu0 %v31_v2, %s164_s29 }
  0x8e   :  { %v42_v3 = vpop.permute.xlu1 %41  ;;  %v33_v4 = vpop.permute.xlu0 %32 }
  0x92   :  { %v44_v5 = vpop.permute.xlu1 %43  ;;  %v35_v7 = vpop.permute.xlu0 %34 }
  0x93   :  { %v36_v8 = vmax.f32 %v33_v4, %v35_v7  ;;  %v45_v9 = vmax.f32 %v42_v3, %v44_v5 }
  0x95   :  { %v38_v10 = vadd.f32 %v37_v6, %v36_v8  ;;  %v47_v17 = vadd.f32 %v46_v11, %v45_v9 }
  0x96   :  { %v53_v12 = vpop.permute.xlu1 %52  ;;  %v51_v13 = vpop.permute.xlu0 %50 }
  0x97   :  { %v39_v14 = vmax.f32 %v31_v2, %v38_v10  ;;  %v54_v15 = vmax.f32 %v51_v13, %v53_v12 }
  0x99   :  { %v48_v21 = vmax.f32 %v39_v14, %v47_v17  ;;  %v56_v22 = vadd.f32 %v55_v16, %v54_v15 }
  0x9a   :  { %v62_v18 = vpop.permute.xlu1 %61  ;;  %v60_v20 = vpop.permute.xlu0 %59 }
  0x9b   :  { %v63_v23 = vmax.f32 %v60_v20, %v62_v18  ;;  %v57_v28 = vmax.f32 %v48_v21, %v56_v22 }
  0x9d   :  { %v65_v24 = vadd.f32 %v64_v19, %v63_v23 }
  0x9e   :  { %v71_v25 = vpop.permute.xlu1 %70  ;;  %v69_v27 = vpop.permute.xlu0 %68 }
  0x9f   :  { %v72_v29 = vmax.f32 %v69_v27, %v71_v25  ;;  %v66_v30 = vmax.f32 %v57_v28, %v65_v24 }
  0xa1   :  { %v74_v31 = vadd.f32 %v73_v26, %v72_v29 }
  0xa3   :  { %v75_v32 = vmax.f32 %v66_v30, %v74_v31 }
  0xa5   :  { %76 = vst.msk [vmem:[#allocation7] sm:$0xff] %vm27_vm0, %v75_v32 }
  0xa6   :  { %138 = shalt.err (!%p135_p12)
}
  0xa7   :  { %s139_s20 = scalar_lea.hbm %s224_s2, 128 }
  0xa8   :  { %p140_p13 = scmp.ne.s32.totalorder %s224_s2, %s139_s20  ;;  %p143_p0 = scmp.lt.u32.totalorder %s139_s20, %s224_s2 }
  0xaa   :  { %p145_p1 = pnand %p143_p0, %p140_p13 }
  0xac   :  { %148 = shalt.err (!%p145_p1)
}
  0xad   :  { %86 = dma.vmem_to_hbm [thread:$0]  %s84_s17, 128, %s224_s2, [#allocation6]  }
  0xae   :  { %151 = dma.done.wait [#allocation6], 128  }
  0xaf   :  { %152 = vsyncadd [#allocation6], 4294967168 }
  0xb0   :  { %90 = vsyncpa [#allocation5], 1 }
  0xb1   :  { %91 = vsyncpa [#allocation6], 1 }

</bundles_post_ra>
